<compile_context>
chip_gen: v6e
topology: v6e:2x2x1
jax: 0.10.0
libtpu: 0.0.40
codegen_flags: <defaults>
</compile_context>

<pallas_src>
import functools

import jax
import jax.numpy as jnp
from jax.experimental import pallas as pl
from jax.experimental.pallas import tpu as pltpu


def _conv_gemm_kernel(x_ref, w_ref, b_ref, o_ref):
    # x_ref: (TM, K)  bf16   -- K-packed input patches (9 taps * Cin)
    # w_ref: (K, TN)  bf16   -- flattened conv weight tile
    # b_ref: (1, TN)  f32    -- bias tile
    # o_ref: (TM, TN)        -- output tile (input dtype)
    acc = jnp.dot(x_ref[...], w_ref[...], preferred_element_type=jnp.float32)
    o_ref[...] = (acc + b_ref[...]).astype(o_ref.dtype)


def _round_up(x, m):
    return (x + m - 1) // m * m


def downsample(x_nchw, w_hwio, bias, *, compute_dtype=jnp.bfloat16):
    """Conv2d(dim, dim, 3, stride=2, padding=1), PyTorch semantics.

    x_nchw : (N, C, H, W)
    w_hwio : (3, 3, Cin, Cout)   (HWIO layout of the PyTorch weight)
    bias   : (Cout,)
    returns (N, Cout, Ho, Wo) with Ho = floor((H - 1) / 2) + 1
    """
    N, C, H, W = x_nchw.shape
    KH, KW, Cin, Cout = w_hwio.shape
    assert (KH, KW) == (3, 3) and Cin == C and Cout == C

    Ho = (H + 2 - 3) // 2 + 1
    Wo = (W + 2 - 3) // 2 + 1
    out_dtype = x_nchw.dtype

    # ---------------- layout plumbing (plain JAX / XLA) ----------------
    # NCHW -> NHWC (channels on lanes), cast to the MXU compute dtype early so
    # every wrapper intermediate moves half the bytes.
    x = jnp.transpose(x_nchw, (0, 2, 3, 1)).astype(compute_dtype)

    # Zero padding (padding=1), padded up so every strided tap slice is exact.
    Hp, Wp = 2 * Ho + 2, 2 * Wo + 2
    x_pad = jnp.zeros((N, Hp, Wp, C), x.dtype).at[:, 1:1 + H, 1:1 + W, :].set(x)

    # im2col: pack the 9 taps along K.  tap (kh, kw) of output (i, j) reads
    # x_pad[2i + kh, 2j + kw, :].
    taps = []
    for kh in range(3):
        for kw in range(3):
            taps.append(x_pad[:, kh:kh + 2 * Ho:2, kw:kw + 2 * Wo:2, :])
    patches = jnp.stack(taps, axis=3)                    # (N, Ho, Wo, 9, C)

    M = N * Ho * Wo
    K = 9 * C
    xcol = patches.reshape(M, K)                         # (M, 9*Cin), K-packed
    wcol = w_hwio.astype(compute_dtype).reshape(K, Cout)  # ((kh*3+kw)*Cin + c, Cout)

    # ---------------- tiling ----------------
    TM = min(256, _round_up(M, 8))                       # M tile (v5e-safe)
    Coutp = _round_up(Cout, 128)                         # lane-dense output stores
    TN = 256 if Coutp % 256 == 0 else 128                # wide N tile on v6e/v7x
    Mp = _round_up(M, TM)

    xcol = jnp.pad(xcol, ((0, Mp - M), (0, 0)))
    wcol = jnp.pad(wcol, ((0, 0), (0, Coutp - Cout)))
    brow = jnp.pad(bias.astype(jnp.float32), (0, Coutp - Cout)).reshape(1, Coutp)

    in_itm = jnp.dtype(compute_dtype).itemsize
    out_itm = jnp.dtype(out_dtype).itemsize
    # double-buffered input/weight/output tiles + bias, plus headroom.
    tile_bytes = 2 * (TM * K * in_itm + K * TN * in_itm + TM * TN * out_itm + TN * 4)
    vmem_limit = int(min(48 * (1 << 20), max(16 * (1 << 20), tile_bytes + (8 << 20))))

    grid = (Mp // TM, Coutp // TN)

    out = pl.pallas_call(
        _conv_gemm_kernel,
        out_shape=jax.ShapeDtypeStruct((Mp, Coutp), out_dtype),
        grid_spec=pltpu.PrefetchScalarGridSpec(
            num_scalar_prefetch=0,
            grid=grid,
            in_specs=[
                pl.BlockSpec((TM, K), lambda i, j: (i, 0)),
                pl.BlockSpec((K, TN), lambda i, j: (0, j)),
                pl.BlockSpec((1, TN), lambda i, j: (0, j)),
            ],
            out_specs=pl.BlockSpec((TM, TN), lambda i, j: (i, j)),
        ),
        compiler_params=pltpu.CompilerParams(
            dimension_semantics=("parallel", "parallel"),
            vmem_limit_bytes=vmem_limit,
        ),
    )(xcol, wcol, brow)

    out = out[:M, :Cout].reshape(N, Ho, Wo, Cout)
    return jnp.transpose(out, (0, 3, 1, 2))              # NHWC -> NCHW


if __name__ == "__main__":
    key = jax.random.PRNGKey(0)
    kx, kw, kb = jax.random.split(key, 3)

    N, C, H, W = 2, 4, 16, 16
    x = jax.random.normal(kx, (N, C, H, W), dtype=jnp.float32)

    # Deterministic "synthetic checkpoint" for Conv2d(dim, dim, 3, 2, 1).
    # PyTorch weight is (Cout, Cin, 3, 3); we keep HWIO = (3, 3, Cin, Cout).
    fan_in = C * 3 * 3
    bound = 1.0 / (fan_in ** 0.5)
    w_hwio = jax.random.uniform(kw, (3, 3, C, C), jnp.float32, -bound, bound)
    bias = jax.random.uniform(kb, (C,), jnp.float32, -bound, bound)

    out = jax.block_until_ready(downsample(x, w_hwio, bias))

    # Reference: XLA conv at matching precision (bf16 operands, f32 accumulation),
    # same semantics as torch.nn.Conv2d(dim, dim, 3, stride=2, padding=1).
    x_nhwc = jnp.transpose(x, (0, 2, 3, 1)).astype(jnp.bfloat16)
    ref = jax.lax.conv_general_dilated(
        x_nhwc, w_hwio.astype(jnp.bfloat16),
        window_strides=(2, 2), padding=((1, 1), (1, 1)),
        dimension_numbers=("NHWC", "HWIO", "NHWC"),
        preferred_element_type=jnp.float32,
    ) + bias
    ref = jnp.transpose(ref, (0, 3, 1, 2)).astype(x.dtype)

    assert out.shape == (N, C, H // 2, W // 2), out.shape
    assert out.dtype == x.dtype
    err = float(jnp.max(jnp.abs(out - ref)))
    assert jnp.allclose(out, ref, atol=1e-3, rtol=1e-3), err
    print("KERNEL_OK")
</pallas_src>

<mosaic_0001>
module attributes {stable_mosaic.version = 11 : i64} {
  func.func @_conv_gemm_kernel(%arg0: i32, %arg1: i32, %arg2: memref<128x36xbf16, #tpu.memory_space<vmem>>, %arg3: memref<36x128xbf16, #tpu.memory_space<vmem>>, %arg4: memref<1x128xf32, #tpu.memory_space<vmem>>, %arg5: memref<128x128xf32, #tpu.memory_space<vmem>>) attributes {dimension_semantics = [#tpu.dimension_semantics<parallel>, #tpu.dimension_semantics<parallel>], iteration_bounds = array<i64: 1, 1>, scalar_prefetch = 0 : i64, scratch_operands = 0 : i64, tpu.core_type = #tpu.core_type<tc>, window_params = [{transform_indices = @transform_0, window_bounds = array<i64: 128, 36>}, {transform_indices = @transform_1, window_bounds = array<i64: 36, 128>}, {transform_indices = @transform_2, window_bounds = array<i64: 1, 128>}, {transform_indices = @transform_3, window_bounds = array<i64: 128, 128>}]} {
    %c0 = arith.constant 0 : index
    %c0_0 = arith.constant 0 : index
    %0 = vector.load %arg2[%c0, %c0_0] : memref<128x36xbf16, #tpu.memory_space<vmem>>, vector<128x36xbf16>
    %c0_1 = arith.constant 0 : index
    %c0_2 = arith.constant 0 : index
    %1 = vector.load %arg3[%c0_1, %c0_2] : memref<36x128xbf16, #tpu.memory_space<vmem>>, vector<36x128xbf16>
    %cst = arith.constant dense<0.000000e+00> : vector<128x128xf32>
    %2 = tpu.matmul %0, %1, %cst {dimension_numbers = #tpu.dot_dimension_numbers<[1], [0], [0], [1], [0, 0, 1, 1], [], []>} : vector<128x36xbf16>, vector<36x128xbf16>, vector<128x128xf32> -> vector<128x128xf32>
    %c0_3 = arith.constant 0 : index
    %c0_4 = arith.constant 0 : index
    %3 = vector.load %arg4[%c0_3, %c0_4] : memref<1x128xf32, #tpu.memory_space<vmem>>, vector<1x128xf32>
    %4 = vector.broadcast %3 : vector<1x128xf32> to vector<128x128xf32>
    %5 = arith.addf %2, %4 : vector<128x128xf32>
    %c0_5 = arith.constant 0 : index
    %c0_6 = arith.constant 0 : index
    %6 = vector.load %arg5[%c0_5, %c0_6] : memref<128x128xf32, #tpu.memory_space<vmem>>, vector<128x128xf32>
    tpu.vector_store %arg5[%c0_5, %c0_6], %5 {strides = array<i32>} : memref<128x128xf32, #tpu.memory_space<vmem>>, vector<128x128xf32>,
    return
  }
  func.func @transform_0(%arg0: i32, %arg1: i32) -> (i32, i32) {
    %c0_i32 = arith.constant 0 : i32
    %c0_i32_0 = arith.constant 0 : i32
    return %arg0, %c0_i32 : i32, i32
  }
  func.func @transform_1(%arg0: i32, %arg1: i32) -> (i32, i32) {
    %c0_i32 = arith.constant 0 : i32
    %c0_i32_0 = arith.constant 0 : i32
    return %c0_i32, %arg1 : i32, i32
  }
  func.func @transform_2(%arg0: i32, %arg1: i32) -> (i32, i32) {
    %c0_i32 = arith.constant 0 : i32
    %c0_i32_0 = arith.constant 0 : i32
    return %c0_i32, %arg1 : i32, i32
  }
  func.func @transform_3(%arg0: i32, %arg1: i32) -> (i32, i32) {
    %c0_i32 = arith.constant 0 : i32
    return %arg0, %arg1 : i32, i32
  }
}

</mosaic_0001>

<bundles_post_ra>
// kernel: tpu_custom_call.1
= control target key start
LH: loop header
LB: loop body
LE: loop exit
PB: predicated region body
PF: predicated region fallthrough
CT: control target
= control target key end

     0   :  { %vm124_vm0 = vcmask 1041408   ;;  %vm99_vm1 = vcmask 293888   ;;  %s424_s0 = inlined_call_operand.vmem [shape: bf16[128,36], index: 0, kind: input, shape index: {}]   ;;  %s425_s1 = inlined_call_operand.vmem [shape: bf16[36,128], index: 1, kind: input, shape index: {}]   ;;  %s426_s2 = inlined_call_operand.vmem [shape: f32[1,128], index: 2, kind: input, shape index: {}]   ;;  %s427_s3 = inlined_call_operand.hbm [shape: f32[128,128], index: 3, kind: output, shape index: {}]  }
   0x1   :  { %v321_v0 = vld [vmem:[%s425_s1 + $0x10] ss:$0 sps:$4 sm:$0x33]   ;;  %v322_v1 = vld [vmem:[%s425_s1 + $0x8] sm:$0xff]   ;;  %v323_v3 = vld [vmem:[%s425_s1] sm:$0xff]  }
   0x2   :  { %316 = vmatprep.subr.msk.bf16.mxu0 %vm124_vm0, %v321_v0  ;;  %317 = vmatprep.subr.msk.bf16.mxu1 %vm124_vm0, %v321_v0  ;;  %v126_v2 = vsel %vm124_vm0, %v321_v0, 0  ;;  %v324_v4 = vld [vmem:[%s424_s0] sm:$0xff]   ;;  %v326_v6 = vld [vmem:[%s424_s0 + $0x8] sm:$0xff]   ;;  %v328_v8 = vld [vmem:[%s424_s0 + $0x10] sm:$0xff]  }
   0x3   :  { %289 = vmatpush3.bf16.msra.mxu0 %v126_v2  ;;  %313 = vmatpush3.bf16.msra.mxu1 %v126_v2  ;;  %v325_v5 = vld [vmem:[%s424_s0 + $0x20] sm:$0xff]   ;;  %v327_v7 = vld [vmem:[%s424_s0 + $0x28] sm:$0xff]   ;;  %v329_v9 = vld [vmem:[%s424_s0 + $0x30] sm:$0xff]  }
   0x4   :  { %290 = vmatprep.subr.bf16.mxu0 %v322_v1  ;;  %311 = vmatprep.subr.bf16.mxu1 %v322_v1 }
   0x5   :  { %294 = vmatprep.mubr.msk.bf16.mxu0 %vm99_vm1, %v324_v4  ;;  %302 = vmatprep.mubr.msk.bf16.mxu1 %vm99_vm1, %v325_v5 }
   0x7   :  { %291 = vmatpush3.bf16.msra.mxu0 %v322_v1  ;;  %314 = vmatpush3.bf16.msra.mxu1 %v322_v1 }
   0x8   :  { %292 = vmatprep.subr.bf16.mxu0 %v323_v3  ;;  %312 = vmatprep.subr.bf16.mxu1 %v323_v3 }
   0xb   :  { %293 = vmatpush3.bf16.msra.mxu0 %v323_v3  ;;  %315 = vmatpush3.bf16.msra.mxu1 %v323_v3 }
   0xc   :  { %8 = vsyncpa [#allocation3], 0  ;;  %v330_v10 = vld [vmem:[%s424_s0 + $0x18] sm:$0xff]   ;;  %v257_v12 = vld [vmem:[%s426_s2] ss:$0 sm:$0xff] }
   0xd   :  { %v331_v11 = vld [vmem:[%s424_s0 + $0x38] sm:$0xff]   ;;  %s354_s0 = smov [#allocation2]  }
   0xe   :  { %295 = vmatmul.mubr.msk.bf16.vlgmr.msra.gmra.mxu0 %vm99_vm1, %v326_v6  ;;  %303 = vmatmul.mubr.msk.bf16.vlgmr.msra.gmra.mxu1 %vm99_vm1, %v327_v7  ;;  %s246_s2 = sshll.u32 %s354_s0, 4  ;;  %s247_s2 = int_to_ptr.vmem [resolvable:$true] %s246_s2 }
   0xf   :  { %298 = vmatprep.mubr.msk.bf16.mxu0 %vm99_vm1, %v328_v8  ;;  %306 = vmatprep.mubr.msk.bf16.mxu1 %vm99_vm1, %v329_v9  ;;  %s332_s8 = scalar_lea.vmem %s247_s2, 2048  ;;  %p337_p1 = scmp.lt.s32.totalorder %s247_s2, %s247_s2 }
  0x10   :  { %p333_p0 = scmp.ne.s32.totalorder %s247_s2, %s332_s8  ;;  %p338_p2 = scmp.lt.s32.totalorder %s332_s8, %s332_s8 }
  0x12   :  { %p339_p3 = por %p338_p2, %p337_p1 }
  0x14   :  { %p340_p4 = pnand %p339_p3, %p333_p0 }
  0x16   :  { %299 = vmatmul.mubr.msk.bf16.gmra.mxu0 %vm99_vm1, %v330_v10  ;;  %307 = vmatmul.mubr.msk.bf16.gmra.mxu1 %vm99_vm1, %v331_v11 }
  0xce   :  { %v296_v13 = vpop.f32.mrf.mxu0  ;;  %v304_v14 = vpop.f32.mrf.mxu1 }
  0xcf   :  { %v171_v15 = vadd.f32 %v296_v13, %v257_v12  ;;  %v203_v16 = vadd.f32 %v304_v14, %v257_v12 }
  0xd0   :  { %v162_v17 = vpop.f32.mrf.mxu0  ;;  %v194_v18 = vpop.f32.mrf.mxu1 }
  0xd1   :  { %227 = vst [vmem:[#allocation2 + $0x10] sm:$0xff] %v171_v15  ;;  %235 = vst [vmem:[#allocation2 + $0x50] sm:$0xff] %v203_v16  ;;  %v163_v19 = vadd.f32 %v257_v12, %v162_v17  ;;  %v195_v20 = vadd.f32 %v257_v12, %v194_v18 }
  0xd2   :  { %v297_v21 = vpop.f32.mrf.mxu0  ;;  %v305_v22 = vpop.f32.mrf.mxu1 }
  0xd3   :  { %225 = vst [vmem:[#allocation2] sm:$0xff] %v163_v19  ;;  %233 = vst [vmem:[#allocation2 + $0x40] sm:$0xff] %v195_v20  ;;  %v174_v23 = vadd.f32 %v297_v21, %v257_v12  ;;  %v206_v24 = vadd.f32 %v305_v22, %v257_v12 }
  0xd4   :  { %v165_v25 = vpop.f32.mrf.mxu0  ;;  %v197_v26 = vpop.f32.mrf.mxu1 }
  0xd5   :  { %228 = vst [vmem:[#allocation2 + $0x18] sm:$0xff] %v174_v23  ;;  %236 = vst [vmem:[#allocation2 + $0x58] sm:$0xff] %v206_v24  ;;  %v166_v27 = vadd.f32 %v257_v12, %v165_v25  ;;  %v198_v28 = vadd.f32 %v257_v12, %v197_v26 }
  0xd6   :  { %v300_v29 = vpop.f32.mrf.mxu0  ;;  %v308_v30 = vpop.f32.mrf.mxu1 }
  0xd7   :  { %226 = vst [vmem:[#allocation2 + $0x8] sm:$0xff] %v166_v27  ;;  %234 = vst [vmem:[#allocation2 + $0x48] sm:$0xff] %v198_v28  ;;  %v187_v31 = vadd.f32 %v300_v29, %v257_v12  ;;  %v219_v32 = vadd.f32 %v308_v30, %v257_v12 }
  0xd8   :  { %v178_v33 = vpop.f32.mrf.mxu0  ;;  %v210_v34 = vpop.f32.mrf.mxu1 }
  0xd9   :  { %231 = vst [vmem:[#allocation2 + $0x30] sm:$0xff] %v187_v31  ;;  %239 = vst [vmem:[#allocation2 + $0x70] sm:$0xff] %v219_v32  ;;  %v179_v35 = vadd.f32 %v257_v12, %v178_v33  ;;  %v211_v36 = vadd.f32 %v257_v12, %v210_v34 }
  0xda   :  { %v301_v37 = vpop.f32.mrf.mxu0  ;;  %v309_v38 = vpop.f32.mrf.mxu1 }
  0xdb   :  { %229 = vst [vmem:[#allocation2 + $0x20] sm:$0xff] %v179_v35  ;;  %237 = vst [vmem:[#allocation2 + $0x60] sm:$0xff] %v211_v36  ;;  %v190_v39 = vadd.f32 %v301_v37, %v257_v12  ;;  %v222_v40 = vadd.f32 %v309_v38, %v257_v12 }
  0xdc   :  { %v181_v41 = vpop.f32.mrf.mxu0  ;;  %v213_v42 = vpop.f32.mrf.mxu1 }
  0xdd   :  { %232 = vst [vmem:[#allocation2 + $0x38] sm:$0xff] %v190_v39  ;;  %240 = vst [vmem:[#allocation2 + $0x78] sm:$0xff] %v222_v40  ;;  %v182_v43 = vadd.f32 %v257_v12, %v181_v41  ;;  %v214_v44 = vadd.f32 %v257_v12, %v213_v42 }
  0xdf   :  { %230 = vst [vmem:[#allocation2 + $0x28] sm:$0xff] %v182_v43  ;;  %238 = vst [vmem:[#allocation2 + $0x68] sm:$0xff] %v214_v44 }
  0xe0   :  { %343 = shalt.err (!%p340_p4)
}
  0xe1   :  { %s355_s9 = smov 128   ;;  %s356_s10 = smov 8  }
  0xe2   :  { %252 = dma.vmem_to_hbm [thread:$0]  %s247_s2, 2048, %s427_s3, [#allocation3], %s355_s9, %s355_s9, %s356_s10  }
  0xe3   :  { %352 = dma.done.wait [#allocation3], 2048  }
  0xe4   :  { %353 = vsyncadd [#allocation3], 4294965248 }
  0xe5   :  { %256 = vsyncpa [#allocation3], 1 }

</bundles_post_ra>
